<compile_context>
chip_gen: v6e
topology: v6e:2x2x1
jax: 0.10.0
libtpu: 0.0.40
codegen_flags: <defaults>
</compile_context>

<pallas_src>
import functools

import numpy as np
import jax
import jax.numpy as jnp
from jax.experimental import pallas as pl
from jax.experimental.pallas import tpu as pltpu


# ----------------------------------------------------------------------------
# helpers
# ----------------------------------------------------------------------------
def _round_up(x, m):
    return ((x + m - 1) // m) * m


# ----------------------------------------------------------------------------
# Pallas kernels
# ----------------------------------------------------------------------------
def _sparse_conv_kernel(x_ref, m_ref, w_ref, s_ref, t_ref, o_ref, acc_ref,
                        *, slope, fuse_bn):
    """Per-tap accumulated sparse conv with fused BN+LeakyReLU prologue.

    Grid = (M_tiles [parallel], K_taps [arbitrary]).
      x_ref : (1, TM, C)   gathered features for tap k        (bf16)
      m_ref : (1, TM, 1)   1.0 valid / 0.0 missing-neighbour  (f32)
      w_ref : (1, C, Cout) weights for tap k                  (bf16)
      s_ref : (1, C)       BN scale (gamma / sqrt(var+eps))   (f32)
      t_ref : (1, C)       BN shift (beta)                    (f32)
      o_ref : (TM, Cout)   output tile                        (bf16)
      acc   : (TM, Cout)   f32 VMEM accumulator
    """
    k = pl.program_id(1)

    @pl.when(k == 0)
    def _init():
        acc_ref[...] = jnp.zeros_like(acc_ref)

    x = x_ref[0].astype(jnp.float32)                  # (TM, C)
    if fuse_bn:
        x = x * s_ref[...] + t_ref[...]               # eval-mode BN affine
        x = jnp.where(x > 0, x, x * slope)            # LeakyReLU
    x = x * m_ref[0]                                  # zero missing taps / padding

    acc_ref[...] += jnp.dot(x.astype(jnp.bfloat16), w_ref[0],
                            preferred_element_type=jnp.float32)

    @pl.when(k == pl.num_programs(1) - 1)
    def _finalize():
        o_ref[...] = acc_ref[...].astype(o_ref.dtype)


def _bn_act_kernel(x_ref, s_ref, t_ref, o_ref, *, slope):
    y = x_ref[...].astype(jnp.float32) * s_ref[...] + t_ref[...]
    o_ref[...] = jnp.where(y > 0, y, y * slope)


# ----------------------------------------------------------------------------
# Pallas wrappers
# ----------------------------------------------------------------------------
def fused_sparse_conv(x, nbr, W, scale=None, shift=None, slope=0.0, tm=256):
    """y[i] = sum_k act(bn(x[nbr[i,k]])) @ W[k]   (missing neighbours -> 0).

    x   : (M_in, C)       active-site features (any float dtype; cast to bf16)
    nbr : (M_out, K)      numpy rulebook, sentinel index == M_in for "missing"
    W   : (K, C, Cout)    per-tap weights
    scale/shift : (1, C)  fused BatchNormLeakyReLU params (None -> no BN/act)

    TM is sized conservatively for v7x's 64 MiB VMEM; on v5e/v6e it can be
    raised to 1024-2048 for better HBM-roofline utilisation.
    """
    x = jnp.asarray(x, jnp.bfloat16)
    W = jnp.asarray(W, jnp.bfloat16)
    M_in, C = x.shape
    M_out, K = nbr.shape
    Kw, Cw, Cout = W.shape
    assert Kw == K and Cw == C, (W.shape, (K, C))

    TM = min(tm, _round_up(M_out, 8))
    Mp = _round_up(M_out, TM)
    n_m = Mp // TM

    # --- rulebook -> tap-major clamped indices + validity mask (numpy glue) ---
    nbr_t = np.full((K, Mp), M_in, dtype=np.int32)
    nbr_t[:, :M_out] = np.asarray(nbr, dtype=np.int32).T
    valid = nbr_t != M_in
    idx = np.where(valid, nbr_t, 0).astype(np.int32)           # clamp, no sentinel row
    mask = valid.astype(np.float32)[..., None]                 # (K, Mp, 1)

    x_taps = jnp.take(x, jnp.asarray(idx), axis=0)             # (K, Mp, C) bf16

    fuse_bn = scale is not None
    if fuse_bn:
        s = jnp.asarray(scale, jnp.float32).reshape(1, C)
        t = jnp.asarray(shift, jnp.float32).reshape(1, C)
    else:
        s = jnp.ones((1, C), jnp.float32)
        t = jnp.zeros((1, C), jnp.float32)

    bytes_acc = int(K * Mp * C * 2 + K * Mp * 4 + K * C * Cout * 2
                    + Mp * Cout * 2 + 2 * C * 4)
    kernel = functools.partial(_sparse_conv_kernel,
                               slope=float(slope), fuse_bn=fuse_bn)
    out = pl.pallas_call(
        kernel,
        out_shape=jax.ShapeDtypeStruct((Mp, Cout), jnp.bfloat16),
        grid=(n_m, K),
        in_specs=[
            pl.BlockSpec((1, TM, C), lambda i, k: (k, i, 0)),    # gathered X, tap k
            pl.BlockSpec((1, TM, 1), lambda i, k: (k, i, 0)),    # validity mask
            pl.BlockSpec((1, C, Cout), lambda i, k: (k, 0, 0)),  # weights, tap k
            pl.BlockSpec((1, C), lambda i, k: (0, 0)),           # BN scale
            pl.BlockSpec((1, C), lambda i, k: (0, 0)),           # BN shift
        ],
        out_specs=pl.BlockSpec((TM, Cout), lambda i, k: (i, 0)),
        scratch_shapes=[pltpu.VMEM((TM, Cout), jnp.float32)],
        compiler_params=pltpu.CompilerParams(
            dimension_semantics=("parallel", "arbitrary")),
        cost_estimate=pl.CostEstimate(flops=2 * Mp * K * C * Cout,
                                      transcendentals=0,
                                      bytes_accessed=bytes_acc),
    )(x_taps, jnp.asarray(mask), W, s, t)
    return out[:M_out]


def fused_deconv(x_coarse, W_full, scale, shift, slope, parent, kidx):
    """scn.Deconvolution(2,2,2): one coarse-side matmul + (parent, kidx) gather.

    Z = act(bn(x_coarse)) @ [W_0 | ... | W_7]   -> (Mc, 8*nl)
    out[r] = Z[parent[r]].reshape(8, nl)[kidx[r]]
    """
    Mc, Cc = x_coarse.shape
    nl8 = W_full.shape[-1]
    nl = nl8 // 8
    ident = np.arange(Mc, dtype=np.int32)[:, None]            # K=1 identity rulebook
    Z = fused_sparse_conv(x_coarse, ident, W_full,
                          scale=scale, shift=shift, slope=slope)
    Z3 = Z.reshape(Mc, 8, nl)
    return Z3[jnp.asarray(parent), jnp.asarray(kidx)]         # (Mf, nl)


def bn_relu(x, scale, shift, slope=0.0, tm=512):
    """Final eval-mode BatchNorm(Leaky)ReLU, M-tiled elementwise Pallas kernel."""
    x = jnp.asarray(x)
    M, C = x.shape
    TM = min(tm, _round_up(M, 8))
    Mp = _round_up(M, TM)
    x_p = jnp.zeros((Mp, C), x.dtype).at[:M].set(x)
    s = jnp.asarray(scale, jnp.float32).reshape(1, C)
    t = jnp.asarray(shift, jnp.float32).reshape(1, C)
    out = pl.pallas_call(
        functools.partial(_bn_act_kernel, slope=float(slope)),
        out_shape=jax.ShapeDtypeStruct((Mp, C), jnp.float32),
        grid=(Mp // TM,),
        in_specs=[
            pl.BlockSpec((TM, C), lambda i: (i, 0)),
            pl.BlockSpec((1, C), lambda i: (0, 0)),
            pl.BlockSpec((1, C), lambda i: (0, 0)),
        ],
        out_specs=pl.BlockSpec((TM, C), lambda i: (i, 0)),
        compiler_params=pltpu.CompilerParams(dimension_semantics=("parallel",)),
    )(x_p, s, t)
    return out[:M]


# ----------------------------------------------------------------------------
# Rulebook construction (host-side numpy glue)
# ----------------------------------------------------------------------------
def voxelize(coords, feats):
    """scn.InputLayer(mode=4): average features of points sharing a voxel."""
    uniq, inv = np.unique(coords, axis=0, return_inverse=True)
    inv = inv.reshape(-1)
    M = uniq.shape[0]
    sums = np.zeros((M, feats.shape[1]), np.float32)
    np.add.at(sums, inv, feats)
    counts = np.bincount(inv, minlength=M).astype(np.float32)[:, None]
    return uniq.astype(np.int32), sums / counts, inv.astype(np.int32)


def _lookup_grid(coords, S):
    # TODO(synk): dense (S,S,S) lookup is fine for small demo grids; switch to a
    #             hash map before running at the module default full_scale=4096.
    grid = -np.ones((S, S, S), np.int32)
    grid[coords[:, 0], coords[:, 1], coords[:, 2]] = np.arange(
        len(coords), dtype=np.int32)
    return grid


def sm_rulebook(coords, S):
    """Neighbour indices for 3x3x3 submanifold conv; sentinel = len(coords)."""
    M = len(coords)
    grid = _lookup_grid(coords, S)
    offs = [(dx, dy, dz) for dx in (-1, 0, 1) for dy in (-1, 0, 1) for dz in (-1, 0, 1)]
    nbr = np.full((M, 27), M, np.int32)
    for k, (dx, dy, dz) in enumerate(offs):
        q = coords + np.array([dx, dy, dz], np.int32)
        valid = np.all((q >= 0) & (q < S), axis=1)
        qc = np.clip(q, 0, S - 1)
        idx = grid[qc[:, 0], qc[:, 1], qc[:, 2]]
        nbr[:, k] = np.where(valid & (idx >= 0), idx, M)
    return nbr


def down_rulebook(coords, S):
    """Strided 2x2x2 conv / deconv rulebooks between level l and l+1."""
    M = len(coords)
    coarse = np.unique(coords // 2, axis=0).astype(np.int32)
    Mc = len(coarse)
    fine_grid = _lookup_grid(coords, S)
    offs = [(dx, dy, dz) for dx in (0, 1) for dy in (0, 1) for dz in (0, 1)]
    child = np.full((Mc, 8), M, np.int32)
    for k, off in enumerate(offs):
        q = coarse * 2 + np.array(off, np.int32)
        idx = fine_grid[q[:, 0], q[:, 1], q[:, 2]]
        child[:, k] = np.where(idx >= 0, idx, M)
    coarse_grid = _lookup_grid(coarse, max(S // 2, 1))
    parent = coarse_grid[coords[:, 0] // 2, coords[:, 1] // 2, coords[:, 2] // 2]
    rem = coords % 2
    kidx = rem[:, 0] * 4 + rem[:, 1] * 2 + rem[:, 2]
    return coarse, child, parent.astype(np.int32), kidx.astype(np.int32)


# ----------------------------------------------------------------------------
# Parameters (weights stacked per-tap, bf16; BN folded to eval-mode affine)
# ----------------------------------------------------------------------------
def init_params(key, cfg):
    m, Cin, num_planes = cfg["m"], cfg["in_channels"], cfg["num_planes"]
    n_planes = [(n + 1) * m for n in range(num_planes)]
    keys = iter(jax.random.split(key, 512))

    def w(k_taps, cin, cout, fan=None):
        fan = fan if fan is not None else k_taps * cin
        wf = jax.random.normal(next(keys), (k_taps, cin, cout), jnp.float32)
        return (wf * np.sqrt(2.0 / fan)).astype(jnp.bfloat16)

    def bn(c, eps=1e-5):
        g = 1.0 + 0.1 * jax.random.normal(next(keys), (c,), jnp.float32)
        b = 0.1 * jax.random.normal(next(keys), (c,), jnp.float32)
        # eval-mode running stats: mean=0, var=1  ->  scale = g/sqrt(1+eps), shift = b
        return (g / jnp.sqrt(1.0 + eps)).reshape(1, c), b.reshape(1, c)

    params = {"n_planes": n_planes}
    params["sc1_w"] = w(27, Cin, m)
    L = num_planes - 1
    enc, dec = [], []
    for l in range(L):
        nl, nlp1 = n_planes[l], n_planes[l + 1]
        s1, t1 = bn(nl)
        s2, t2 = bn(nl)
        enc.append(dict(bn1_s=s1, bn1_t=t1, sm_w=w(27, nl, nl),
                        bn2_s=s2, bn2_t=t2, down_w=w(8, nl, nlp1)))
        s3, t3 = bn(nlp1)
        s4, t4 = bn(2 * nl)
        dec.append(dict(bn1_s=s3, bn1_t=t3,
                        de_w=w(1, nlp1, 8 * nl, fan=8 * nlp1),   # [W_0 | ... | W_7]
                        bn2_s=s4, bn2_t=t4, sm_w=w(27, 2 * nl, nl)))
    params["enc"], params["dec"] = enc, dec
    nL = n_planes[-1]
    s_mid, t_mid = bn(nL)
    params["mid"] = dict(bn_s=s_mid, bn_t=t_mid, sm_w=w(27, nL, nL))
    s_r, t_r = bn(m)
    params["bnr_s"], params["bnr_t"] = s_r, t_r
    return params


# ----------------------------------------------------------------------------
# Forward pass (mirrors UNetSCNContra.forward)
# ----------------------------------------------------------------------------
def unet_scn_contra_forward(params, coords_np, feats_np, cfg):
    L = cfg["num_planes"] - 1
    S = cfg["full_scale"]
    lk = cfg["leakiness"]
    lout = cfg["lout"]

    # InputLayer (mode=4)
    vox_coords, vox_feats, point2vox = voxelize(coords_np, feats_np)

    # rulebooks for all levels
    sm_rb, child_rb, parent_rb, kidx_rb = [], [], [], []
    cur, curS = vox_coords, S
    for _ in range(L):
        sm_rb.append(sm_rulebook(cur, curS))
        coarse, child, parent, kidx = down_rulebook(cur, curS)
        child_rb.append(child)
        parent_rb.append(parent)
        kidx_rb.append(kidx)
        cur, curS = coarse, curS // 2
    sm_rb.append(sm_rulebook(cur, curS))

    x = jnp.asarray(vox_feats, jnp.float32).astype(jnp.bfloat16)

    # SC1 (no preceding BN / activation)
    x = fused_sparse_conv(x, sm_rb[0], params["sc1_w"])

    inter = []
    for l in range(L):
        p = params["enc"][l]
        # conv1x1 block: BN1+LeakyReLU fused into the submanifold conv
        x = fused_sparse_conv(x, sm_rb[l], p["sm_w"],
                              scale=p["bn1_s"], shift=p["bn1_t"], slope=lk)
        inter.append(x)
        # strided conv: BN2+LeakyReLU fused into the 2x2x2 down conv
        x = fused_sparse_conv(x, child_rb[l], p["down_w"],
                              scale=p["bn2_s"], shift=p["bn2_t"], slope=lk)

    pm = params["mid"]
    x = fused_sparse_conv(x, sm_rb[L], pm["sm_w"],
                          scale=pm["bn_s"], shift=pm["bn_t"], slope=lk)

    x_m = None
    for i in reversed(range(L)):
        p = params["dec"][i]
        x = fused_deconv(x, p["de_w"], p["bn1_s"], p["bn1_t"], lk,
                         parent_rb[i], kidx_rb[i])               # b_join
        x = jnp.concatenate([inter[i], x], axis=1)               # join_table
        x = fused_sparse_conv(x, sm_rb[i], p["sm_w"],
                              scale=p["bn2_s"], shift=p["bn2_t"], slope=lk)  # a_join
        if L - i == lout:
            # TODO(synk): scn.OutputLayer at an intermediate resolution; return
            #             the active-site feature matrix at that level directly.
            x_m = x

    x = bn_relu(x, params["bnr_s"], params["bnr_t"], slope=0.0)  # BatchNormReLU
    out = x[jnp.asarray(point2vox)]                              # OutputLayer
    return x_m, out


# ----------------------------------------------------------------------------
if __name__ == "__main__":
    cfg = dict(
        in_channels=4,   # UNetSCNContra(in_channels=4, ...)
        m=8,
        num_planes=4,    # 3 encoder/decoder levels
        full_scale=16,   # small voxel grid for the demo (module default 4096)
        leakiness=0.0,
        lout=2,
    )
    key = jax.random.PRNGKey(0)
    kc, kf = jax.random.split(key)
    N = 256
    coords = np.asarray(
        jax.random.randint(kc, (N, 3), 0, cfg["full_scale"]), dtype=np.int32)
    feats = np.asarray(
        jax.random.normal(kf, (N, cfg["in_channels"])), dtype=np.float32)

    params = init_params(jax.random.PRNGKey(1), cfg)

    x_m, out = unet_scn_contra_forward(params, coords, feats, cfg)
    out = jax.block_until_ready(out)
    if x_m is not None:
        jax.block_until_ready(x_m)

    assert out.shape == (N, cfg["m"]), out.shape
    assert bool(jnp.all(jnp.isfinite(out)))
    print("KERNEL_OK")
</pallas_src>

<mosaic_0001>
module attributes {stable_mosaic.version = 11 : i64} {
  func.func @_sparse_conv_kernel(%arg0: i32, %arg1: i32, %arg2: memref<1x248x4xbf16, #tpu.memory_space<vmem>>, %arg3: memref<1x248x1xf32, #tpu.memory_space<vmem>>, %arg4: memref<1x4x8xbf16, #tpu.memory_space<vmem>>, %arg5: memref<1x4xf32, #tpu.memory_space<vmem>>, %arg6: memref<1x4xf32, #tpu.memory_space<vmem>>, %arg7: memref<248x8xbf16, #tpu.memory_space<vmem>>, %arg8: memref<248x8xf32, #tpu.memory_space<vmem>>) attributes {dimension_semantics = [#tpu.dimension_semantics<parallel>, #tpu.dimension_semantics<arbitrary>], iteration_bounds = array<i64: 1, 27>, scalar_prefetch = 0 : i64, scratch_operands = 1 : i64, tpu.core_type = #tpu.core_type<tc>, window_params = [{transform_indices = @transform_0, window_bounds = array<i64: 1, 248, 4>}, {transform_indices = @transform_1, window_bounds = array<i64: 1, 248, 1>}, {transform_indices = @transform_2, window_bounds = array<i64: 1, 4, 8>}, {pipeline_mode = #tpu.pipeline_mode<synchronous>, transform_indices = @transform_3, window_bounds = array<i64: 1, 4>}, {pipeline_mode = #tpu.pipeline_mode<synchronous>, transform_indices = @transform_4, window_bounds = array<i64: 1, 4>}, {transform_indices = @transform_5, window_bounds = array<i64: 248, 8>}]} {
    %c0_i32 = arith.constant 0 : i32
    %0 = arith.cmpi eq, %arg1, %c0_i32 : i32
    %1 = arith.extui %0 : i1 to i32
    %c0_i32_0 = arith.constant 0 : i32
    %2 = arith.cmpi ne, %1, %c0_i32_0 : i32
    scf.if %2 {
      %cst_14 = arith.constant 0.000000e+00 : f32
      %20 = vector.broadcast %cst_14 : f32 to vector<248x8xf32>
      %c0_15 = arith.constant 0 : index
      %c0_16 = arith.constant 0 : index
      %21 = vector.load %arg8[%c0_15, %c0_16] : memref<248x8xf32, #tpu.memory_space<vmem>>, vector<248x8xf32>
      tpu.vector_store %arg8[%c0_15, %c0_16], %20 {strides = array<i32>} : memref<248x8xf32, #tpu.memory_space<vmem>>, vector<248x8xf32>,
    } else {
    }
    %c0 = arith.constant 0 : index
    %c0_1 = arith.constant 0 : index
    %c0_2 = arith.constant 0 : index
    %3 = vector.load %arg2[%c0, %c0_1, %c0_2] : memref<1x248x4xbf16, #tpu.memory_space<vmem>>, vector<1x248x4xbf16>
    %4 = vector.shape_cast %3 : vector<1x248x4xbf16> to vector<248x4xbf16>
    %5 = arith.extf %4 : vector<248x4xbf16> to vector<248x4xf32>
    %c0_3 = arith.constant 0 : index
    %c0_4 = arith.constant 0 : index
    %c0_5 = arith.constant 0 : index
    %6 = vector.load %arg3[%c0_3, %c0_4, %c0_5] : memref<1x248x1xf32, #tpu.memory_space<vmem>>, vector<1x248x1xf32>
    %7 = vector.shape_cast %6 : vector<1x248x1xf32> to vector<248x1xf32>
    %8 = vector.broadcast %7 : vector<248x1xf32> to vector<248x4xf32>
    %9 = arith.mulf %5, %8 : vector<248x4xf32>
    %c0_6 = arith.constant 0 : index
    %c0_7 = arith.constant 0 : index
    %10 = vector.load %arg8[%c0_6, %c0_7] : memref<248x8xf32, #tpu.memory_space<vmem>>, vector<248x8xf32>
    %11 = arith.truncf %9 : vector<248x4xf32> to vector<248x4xbf16>
    %c0_8 = arith.constant 0 : index
    %c0_9 = arith.constant 0 : index
    %c0_10 = arith.constant 0 : index
    %12 = vector.load %arg4[%c0_8, %c0_9, %c0_10] : memref<1x4x8xbf16, #tpu.memory_space<vmem>>, vector<1x4x8xbf16>
    %13 = vector.shape_cast %12 : vector<1x4x8xbf16> to vector<4x8xbf16>
    %cst = arith.constant dense<0.000000e+00> : vector<248x8xf32>
    %14 = tpu.matmul %11, %13, %cst {dimension_numbers = #tpu.dot_dimension_numbers<[1], [0], [0], [1], [0, 0, 1, 1], [], []>} : vector<248x4xbf16>, vector<4x8xbf16>, vector<248x8xf32> -> vector<248x8xf32>
    %15 = arith.addf %10, %14 : vector<248x8xf32>
    %c0_11 = arith.constant 0 : index
    %c0_12 = arith.constant 0 : index
    %16 = vector.load %arg8[%c0_11, %c0_12] : memref<248x8xf32, #tpu.memory_space<vmem>>, vector<248x8xf32>
    tpu.vector_store %arg8[%c0_11, %c0_12], %15 {strides = array<i32>} : memref<248x8xf32, #tpu.memory_space<vmem>>, vector<248x8xf32>,
    %c26_i32 = arith.constant 26 : i32
    %17 = arith.cmpi eq, %arg1, %c26_i32 : i32
    %18 = arith.extui %17 : i1 to i32
    %c0_i32_13 = arith.constant 0 : i32
    %19 = arith.cmpi ne, %18, %c0_i32_13 : i32
    scf.if %19 {
      %c0_14 = arith.constant 0 : index
      %c0_15 = arith.constant 0 : index
      %20 = vector.load %arg8[%c0_14, %c0_15] : memref<248x8xf32, #tpu.memory_space<vmem>>, vector<248x8xf32>
      %21 = arith.truncf %20 : vector<248x8xf32> to vector<248x8xbf16>
      %c0_16 = arith.constant 0 : index
      %c0_17 = arith.constant 0 : index
      %22 = vector.load %arg7[%c0_16, %c0_17] : memref<248x8xbf16, #tpu.memory_space<vmem>>, vector<248x8xbf16>
      tpu.vector_store %arg7[%c0_16, %c0_17], %21 {strides = array<i32>} : memref<248x8xbf16, #tpu.memory_space<vmem>>, vector<248x8xbf16>,
    } else {
    }
    return
  }
  func.func @transform_0(%arg0: i32, %arg1: i32) -> (i32, i32, i32) {
    %c0_i32 = arith.constant 0 : i32
    %c0_i32_0 = arith.constant 0 : i32
    return %arg1, %arg0, %c0_i32 : i32, i32, i32
  }
  func.func @transform_1(%arg0: i32, %arg1: i32) -> (i32, i32, i32) {
    %c0_i32 = arith.constant 0 : i32
    %c0_i32_0 = arith.constant 0 : i32
    return %arg1, %arg0, %c0_i32 : i32, i32, i32
  }
  func.func @transform_2(%arg0: i32, %arg1: i32) -> (i32, i32, i32) {
    %c0_i32 = arith.constant 0 : i32
    %c0_i32_0 = arith.constant 0 : i32
    %c0_i32_1 = arith.constant 0 : i32
    return %arg1, %c0_i32, %c0_i32_0 : i32, i32, i32
  }
  func.func @transform_3(%arg0: i32, %arg1: i32) -> (i32, i32) {
    %c0_i32 = arith.constant 0 : i32
    %c0_i32_0 = arith.constant 0 : i32
    %c0_i32_1 = arith.constant 0 : i32
    return %c0_i32, %c0_i32_0 : i32, i32
  }
  func.func @transform_4(%arg0: i32, %arg1: i32) -> (i32, i32) {
    %c0_i32 = arith.constant 0 : i32
    %c0_i32_0 = arith.constant 0 : i32
    %c0_i32_1 = arith.constant 0 : i32
    return %c0_i32, %c0_i32_0 : i32, i32
  }
  func.func @transform_5(%arg0: i32, %arg1: i32) -> (i32, i32) {
    %c0_i32 = arith.constant 0 : i32
    %c0_i32_0 = arith.constant 0 : i32
    return %arg0, %c0_i32 : i32, i32
  }
}

</mosaic_0001>

<bundles_post_ra>
// kernel: tpu_custom_call.1
= control target key start
LH: loop header
LB: loop body
LE: loop exit
PB: predicated region body
PF: predicated region fallthrough
CT: control target
= control target key end

     0   :  { %s1543_s18 = smov 0   ;;  %s1545_s19 = smov 0   ;;  %s1841_s0 = inlined_call_operand.vmem [shape: bf16[27,248,4], index: 0, kind: input, shape index: {}]   ;;  %s1842_s1 = inlined_call_operand.vmem [shape: f32[27,248,1], index: 1, kind: input, shape index: {}]   ;;  %s1843_s2 = inlined_call_operand.vmem [shape: bf16[27,4,8], index: 2, kind: input, shape index: {}]   ;;  %s1844_s3 = inlined_call_operand.vmem [shape: f32[1,4], index: 3, kind: input, shape index: {}]   ;;  %s1845_s4 = inlined_call_operand.vmem [shape: f32[1,4], index: 4, kind: input, shape index: {}]   ;;  %s1846_s5 = inlined_call_operand.vmem [shape: bf16[248,8], index: 5, kind: output, shape index: {}]  }
   0x1   :  { %s1547_s20 = smov 0  }
   0x2 LB: > { %s24_s3 = sadd.s32 1, %s1505_s19  ;;  %p1240_p0 = scmp.ge.s32.totalorder %s1509_s20, 1  ;;  %s1509_s20 = sphi %s1547_s20, %s15_s20   ;;  %s1505_s19 = sphi %s1545_s19, %s1848_s19   ;;  %s1501_s18 = sphi %s1543_s18, %s1847_s18  }
   0x3   : > { %p25_p1 = scmp.ge.s32.totalorder %s24_s3, 27  ;;  %p232_p2 = scmp.lt.s32.totalorder %s1509_s20, 28 }
   0x5   : > { %s1850_s3 = smov (%p25_p1, %s24_s3), 0  ;;  %p233_p3 = pnand %p1240_p0, %p232_p2 }
   0x6   : > { %p278_p4 = scmp.lt.s32.totalorder (!%p233_p3), %s1501_s18, 26  ;;  %p1244_p5 = scmp.ne.s32.totalorder (!%p233_p3), %s1501_s18, 0 }
   0x7   : > { %236 = sbr.rel (%p233_p3) target bundleno = 446 (0x1be), region = 40 }
   0xc   : > { %s279_s4 = scalar_select %p278_p4, %s1501_s18, 26 }
   0xd   : > { %311 = sbr.rel (%p1244_p5) target bundleno = 35 (0x23), region = 44 }
   0xe   : > { %s1457_s21 = smul.u32 124, %s279_s4  ;;  %s1243_s22 = sshll.u32 %s279_s4, 1 }
   0xf   : > { %s1458_s23 = smul.u32 248, %s279_s4  ;;  %s1568_s26 = scalar_lea.vmem %s1843_s2, %s1243_s22 }
  0x10   : > { %s1573_s29 = scalar_lea.vmem %s1841_s0, %s1457_s21 }
  0x11   : > { %s1578_s7 = scalar_lea.vmem %s1842_s1, %s1458_s23 }
  0x12   : > { %vm312_vm0 = vcmask 64512   ;;  %v1511_v0 = vmov 0.0  }
  0x13   : > { %313 = vst.msk [vmem:[#allocation2] sm:$0xff] %vm312_vm0, %v1511_v0  ;;  %314 = vst.msk [vmem:[#allocation2 + $0x8] sm:$0xff] %vm312_vm0, %v1511_v0 }
  0x14   : > { %315 = vst.msk [vmem:[#allocation2 + $0x10] sm:$0xff] %vm312_vm0, %v1511_v0  ;;  %316 = vst.msk [vmem:[#allocation2 + $0x18] sm:$0xff] %vm312_vm0, %v1511_v0 }
  0x15   : > { %317 = vst.msk [vmem:[#allocation2 + $0x20] sm:$0xff] %vm312_vm0, %v1511_v0  ;;  %318 = vst.msk [vmem:[#allocation2 + $0x28] sm:$0xff] %vm312_vm0, %v1511_v0 }
  0x16   : > { %319 = vst.msk [vmem:[#allocation2 + $0x30] sm:$0xff] %vm312_vm0, %v1511_v0  ;;  %320 = vst.msk [vmem:[#allocation2 + $0x38] sm:$0xff] %vm312_vm0, %v1511_v0 }
  0x17   : > { %321 = vst.msk [vmem:[#allocation2 + $0x40] sm:$0xff] %vm312_vm0, %v1511_v0  ;;  %322 = vst.msk [vmem:[#allocation2 + $0x48] sm:$0xff] %vm312_vm0, %v1511_v0 }
  0x18   : > { %323 = vst.msk [vmem:[#allocation2 + $0x50] sm:$0xff] %vm312_vm0, %v1511_v0  ;;  %324 = vst.msk [vmem:[#allocation2 + $0x58] sm:$0xff] %vm312_vm0, %v1511_v0 }
  0x19   : > { %325 = vst.msk [vmem:[#allocation2 + $0x60] sm:$0xff] %vm312_vm0, %v1511_v0  ;;  %326 = vst.msk [vmem:[#allocation2 + $0x68] sm:$0xff] %vm312_vm0, %v1511_v0 }
  0x1a   : > { %327 = vst.msk [vmem:[#allocation2 + $0x70] sm:$0xff] %vm312_vm0, %v1511_v0  ;;  %328 = vst.msk [vmem:[#allocation2 + $0x78] sm:$0xff] %vm312_vm0, %v1511_v0 }
  0x1b   : > { %329 = vst.msk [vmem:[#allocation2 + $0x80] sm:$0xff] %vm312_vm0, %v1511_v0  ;;  %330 = vst.msk [vmem:[#allocation2 + $0x88] sm:$0xff] %vm312_vm0, %v1511_v0 }
  0x1c   : > { %331 = vst.msk [vmem:[#allocation2 + $0x90] sm:$0xff] %vm312_vm0, %v1511_v0  ;;  %332 = vst.msk [vmem:[#allocation2 + $0x98] sm:$0xff] %vm312_vm0, %v1511_v0 }
  0x1d   : > { %333 = vst.msk [vmem:[#allocation2 + $0xa0] sm:$0xff] %vm312_vm0, %v1511_v0  ;;  %334 = vst.msk [vmem:[#allocation2 + $0xa8] sm:$0xff] %vm312_vm0, %v1511_v0 }
  0x1e   : > { %335 = vst.msk [vmem:[#allocation2 + $0xb0] sm:$0xff] %vm312_vm0, %v1511_v0  ;;  %336 = vst.msk [vmem:[#allocation2 + $0xb8] sm:$0xff] %vm312_vm0, %v1511_v0 }
  0x1f   : > { %337 = vst.msk [vmem:[#allocation2 + $0xc0] sm:$0xff] %vm312_vm0, %v1511_v0  ;;  %338 = vst.msk [vmem:[#allocation2 + $0xc8] sm:$0xff] %vm312_vm0, %v1511_v0 }
  0x20   : > { %339 = vst.msk [vmem:[#allocation2 + $0xd0] sm:$0xff] %vm312_vm0, %v1511_v0  ;;  %340 = vst.msk [vmem:[#allocation2 + $0xd8] sm:$0xff] %vm312_vm0, %v1511_v0 }
  0x21   : > { %341 = vst.msk [vmem:[#allocation2 + $0xe0] sm:$0xff] %vm312_vm0, %v1511_v0  ;;  %342 = vst.msk [vmem:[#allocation2 + $0xe8] sm:$0xff] %vm312_vm0, %v1511_v0 }
  0x22   : > { %343 = vst.msk [vmem:[#allocation2 + $0xf0] sm:$0xff] %vm312_vm0, %v1511_v0 }
  0x23 PF: > { %v422_v1 = vld [vmem:[%s1578_s7 + $0x80] sm:$0xff]  ;;  %v1512_v3 = vmov 0   ;;  %v423_v4 = vld [vmem:[%s1578_s7 + $0x88] sm:$0xff]  ;;  %v409_v6 = vld [vmem:[%s1578_s7 + $0x18] sm:$0xff]  ;;  %vm720_vm1 = vcmask 1041408   ;;  %vm671_vm2 = vcmask 31744  }
  0x24   : > { %v406_v2 = vld [vmem:[%s1578_s7] sm:$0xff]  ;;  %1486 = vset.pattern.permute.xlu1 %v1512_v3  ;;  %1485 = vset.pattern.permute.xlu0 %v1512_v3  ;;  %v407_v5 = vld [vmem:[%s1578_s7 + $0x8] sm:$0xff]  ;;  %v408_v7 = vld [vmem:[%s1578_s7 + $0x10] sm:$0xff]  ;;  %vm915_vm3 = vcmask 64512   ;;  %p1261_p6 = scmp.ne.s32.totalorder %s1501_s18, 26 }
  0x25   : > { %519 = vperm.xlu1 %1486, %v422_v1   ;;  %439 = vperm.xlu0 %1485, %v406_v2   ;;  %v425_v8 = vld [vmem:[%s1578_s7 + $0x98] sm:$0xff]  ;;  %v424_v9 = vld [vmem:[%s1578_s7 + $0x90] sm:$0xff]  ;;  %v670_v10 = vld [vmem:[%s1568_s26] sm:$0x3] }
  0x26   : > { %1455 = vmatprep.subr.msk.bf16.mxu0 %vm720_vm1, %v670_v10  ;;  %v722_v11 = vsel %vm720_vm1, %v670_v10, 0  ;;  %1456 = vmatprep.subr.msk.bf16.mxu1 %vm720_vm1, %v670_v10  ;;  %v411_v12 = vld [vmem:[%s1578_s7 + $0x28] sm:$0xff]  ;;  %v410_v13 = vld [vmem:[%s1578_s7 + $0x20] sm:$0xff]  ;;  %v413_v16 = vld [vmem:[%s1578_s7 + $0x38] sm:$0xff] }
  0x27   : > { %1420 = vmatpush3.bf16.msra.mxu0 %v722_v11  ;;  %1454 = vmatpush3.bf16.msra.mxu1 %v722_v11  ;;  %v427_v14 = vld [vmem:[%s1578_s7 + $0xa8] sm:$0xff]  ;;  %v426_v15 = vld [vmem:[%s1578_s7 + $0xa0] sm:$0xff]  ;;  %v412_v17 = vld [vmem:[%s1578_s7 + $0x30] sm:$0xff] }
  0x28   : > { %v429_v18 = vld [vmem:[%s1578_s7 + $0xb8] sm:$0xff]  ;;  %v428_v19 = vld [vmem:[%s1578_s7 + $0xb0] sm:$0xff]  ;;  %v415_v20 = vld [vmem:[%s1578_s7 + $0x48] sm:$0xff] }
  0x29   : > { %524 = vperm.xlu1 %1486, %v423_v4   ;;  %444 = vperm.xlu0 %1485, %v407_v5   ;;  %v414_v21 = vld [vmem:[%s1578_s7 + $0x40] sm:$0xff]  ;;  %v431_v22 = vld [vmem:[%s1578_s7 + $0xc8] sm:$0xff]  ;;  %v417_v24 = vld [vmem:[%s1578_s7 + $0x58] sm:$0xff] }
  0x2a   : > { %v430_v23 = vld [vmem:[%s1578_s7 + $0xc0] sm:$0xff]  ;;  %v416_v25 = vld [vmem:[%s1578_s7 + $0x50] sm:$0xff]  ;;  %v433_v26 = vld [vmem:[%s1578_s7 + $0xd8] sm:$0xff] }
  0x2b   : > { %v432_v27 = vld [vmem:[%s1578_s7 + $0xd0] sm:$0xff]  ;;  %v419_v28 = vld [vmem:[%s1578_s7 + $0x68] sm:$0xff]  ;;  %v418_v29 = vld [vmem:[%s1578_s7 + $0x60] sm:$0xff] }
  0x2c   : > { %v435_v30 = vld [vmem:[%s1578_s7 + $0xe8] sm:$0xff]  ;;  %v434_v31 = vld [vmem:[%s1578_s7 + $0xe0] sm:$0xff]  ;;  %v421_v32 = vld [vmem:[%s1578_s7 + $0x78] sm:$0xff] }
  0x2d   : > { %454 = vperm.xlu1 %1486, %v409_v6   ;;  %449 = vperm.xlu0 %1485, %v408_v7   ;;  %v420_v33 = vld [vmem:[%s1578_s7 + $0x70] sm:$0xff]  ;;  %v1395_v35 = vld [vmem:[%s1573_s29 + $0x40] sm:$0xff]   ;;  %v1388_v43 = vld [vmem:[%s1573_s29 + $0x8] sm:$0xff]  }
  0x2e   : > { %v436_v34 = vld [vmem:[%s1578_s7 + $0xf0] sm:$0xff]  ;;  %v1329_v36 = vld [vmem:[%s1573_s29] sm:$0xff]   ;;  %v1362_v37 = vunpack.c.l.bf16 %v1395_v35  ;;  %v1363_v41 = vunpack.c.h.bf16 %v1395_v35  ;;  %v1335_v47 = vunpack.c.h.bf16 %v1388_v43  ;;  %v1334_v51 = vunpack.c.l.bf16 %v1388_v43  ;;  %v1396_v52 = vld [vmem:[%s1573_s29 + $0x48] sm:$0xff]  }
  0x2f   : > { %v1330_v40 = vunpack.c.l.bf16 %v1329_v36  ;;  %v1331_v42 = vunpack.c.h.bf16 %v1329_v36  ;;  %v1367_v59 = vunpack.c.h.bf16 %v1396_v52  ;;  %v1366_v60 = vunpack.c.l.bf16 %v1396_v52  ;;  %v1389_v61 = vld [vmem:[%s1573_s29 + $0x10] sm:$0xff]  }
  0x30   : > { %v1339_v3 = vunpack.c.h.bf16 %v1389_v61  ;;  %v1338_v4 = vunpack.c.l.bf16 %v1389_v61  ;;  %v1397_v5 = vld [vmem:[%s1573_s29 + $0x50] sm:$0xff]  }
  0x31   : > { %534 = vperm.xlu1 %1486, %v425_v8   ;;  %529 = vperm.xlu0 %1485, %v424_v9   ;;  %v1371_v11 = vunpack.c.h.bf16 %v1397_v5  ;;  %v1393_v61 = vld [vmem:[%s1573_s29 + $0x30] sm:$0xff]  }
  0x35   : > { %464 = vperm.xlu1 %1486, %v411_v12   ;;  %459 = vperm.xlu0 %1485, %v410_v13   ;;  %v1370_v12 = vunpack.c.l.bf16 %v1397_v5  ;;  %v1390_v13 = vld [vmem:[%s1573_s29 + $0x18] sm:$0xff]   ;;  %v1401_v5 = vld [vmem:[%s1573_s29 + $0x70] sm:$0xff]  }
  0x39   : > { %544 = vperm.xlu1 %1486, %v427_v14   ;;  %539 = vperm.xlu0 %1485, %v426_v15  }
  0x3d   : > { %474 = vperm.xlu1 %1486, %v413_v16   ;;  %469 = vperm.xlu0 %1485, %v412_v17  }
  0x41   : > { %554 = vperm.xlu1 %1486, %v429_v18   ;;  %549 = vperm.xlu0 %1485, %v428_v19   ;;  %v1343_v19 = vunpack.c.h.bf16 %v1390_v13 }
  0x45   : > { %484 = vperm.xlu1 %1486, %v415_v20   ;;  %479 = vperm.xlu0 %1485, %v414_v21   ;;  %v1342_v20 = vunpack.c.l.bf16 %v1390_v13  ;;  %v1398_v21 = vld [vmem:[%s1573_s29 + $0x58] sm:$0xff]  }
  0x46   : > { %v1394_v13 = vld [vmem:[%s1573_s29 + $0x38] sm:$0xff]  }
  0x49   : > { %564 = vperm.xlu1 %1486, %v431_v22   ;;  %559 = vperm.xlu0 %1485, %v430_v23  }
  0x4d   : > { %494 = vperm.xlu1 %1486, %v417_v24   ;;  %489 = vperm.xlu0 %1485, %v416_v25  }
  0x51   : > { %574 = vperm.xlu1 %1486, %v433_v26   ;;  %569 = vperm.xlu0 %1485, %v432_v27   ;;  %v1375_v27 = vunpack.c.h.bf16 %v1398_v21 }
  0x55   : > { %504 = vperm.xlu1 %1486, %v419_v28   ;;  %499 = vperm.xlu0 %1485, %v418_v29   ;;  %v1374_v28 = vunpack.c.l.bf16 %v1398_v21  ;;  %v1391_v29 = vld [vmem:[%s1573_s29 + $0x20] sm:$0xff]   ;;  %v374_v21 = vld [vmem:[%s1573_s29 + $0x78] sm:$0xf] }
  0x56   : > { %v1347_v35 = vunpack.c.h.bf16 %v1391_v29  ;;  %v1346_v36 = vunpack.c.l.bf16 %v1391_v29 }
  0x59   : > { %584 = vperm.xlu1 %1486, %v435_v30   ;;  %579 = vperm.xlu0 %1485, %v434_v31  }
  0x5d   : > { %514 = vperm.xlu1 %1486, %v421_v32   ;;  %509 = vperm.xlu0 %1485, %v420_v33  }
  0x61   : > { %589 = vperm.xlu0 %1485, %v436_v34  }
  0xa0   : > { %v520_v38 = vpop.permute.xlu1 %519  ;;  %v440_v39 = vpop.permute.xlu0 %439 }
  0xa1   : > { %v608_v44 = vmul.f32 %v1362_v37, %v520_v38  ;;  %v592_v48 = vmul.f32 %v1330_v40, %v440_v39  ;;  %v1399_v37 = vld [vmem:[%s1573_s29 + $0x60] sm:$0xff]  }
  0xa2   : > { %v1379_v43 = vunpack.c.h.bf16 %v1399_v37 }
  0xa4   : > { %v525_v45 = vpop.permute.xlu1 %524  ;;  %v445_v46 = vpop.permute.xlu0 %444 }
  0xa5   : > { %v609_v49 = vmul.f32 %v1363_v41, %v525_v45  ;;  %v593_v50 = vmul.f32 %v1331_v42, %v445_v46  ;;  %v1392_v45 = vld [vmem:[%s1573_s29 + $0x28] sm:$0xff]  }
  0xa6   : > { %v1350_v52 = vunpack.c.l.bf16 %v1392_v45 }
  0xa7   : > { %v654_v53 = vpack.c.bf16 %v593_v50, %v592_v48  ;;  %v662_v54 = vpack.c.bf16 %v609_v49, %v608_v44  ;;  %v1378_v44 = vunpack.c.l.bf16 %v1399_v37  ;;  %v626_v37 = vld [vmem:[#allocation2 + $0x18] sm:$0xff] }
  0xa8   : > { %v455_v55 = vpop.permute.xlu1 %454  ;;  %v450_v56 = vpop.permute.xlu0 %449 }
  0xa9   : > { %v595_v57 = vmul.f32 %v1335_v47, %v455_v55  ;;  %v594_v58 = vmul.f32 %v1334_v51, %v450_v56  ;;  %1421 = vmatprep.mubr.msk.bf16.mxu0 %vm671_vm2, %v654_v53  ;;  %1437 = vmatprep.mubr.msk.bf16.mxu1 %vm671_vm2, %v662_v54  ;;  %v1351_v51 = vunpack.c.h.bf16 %v1392_v45  ;;  %v1400_v53 = vld [vmem:[%s1573_s29 + $0x68] sm:$0xff]  }
  0xab   : > { %v655_v62 = vpack.c.bf16 %v595_v57, %v594_v58 }
  0xac   : > { %v535_v63 = vpop.permute.xlu1 %534  ;;  %v530_v0 = vpop.permute.xlu0 %529 }
  0xad   : > { %v611_v1 = vmul.f32 %v1367_v59, %v535_v63  ;;  %v610_v2 = vmul.f32 %v1366_v60, %v530_v0  ;;  %1422 = vmatmul.mubr.msk.bf16.vlgmr.msra.gmra.mxu0 %vm671_vm2, %v655_v62  ;;  %v1383_v59 = vunpack.c.h.bf16 %v1400_v53  ;;  %v1382_v60 = vunpack.c.l.bf16 %v1400_v53 }
  0xaf   : > { %v663_v6 = vpack.c.bf16 %v611_v1, %v610_v2 }
  0xb0   : > { %v465_v7 = vpop.permute.xlu1 %464  ;;  %v460_v8 = vpop.permute.xlu0 %459 }
  0xb1   : > { %v597_v9 = vmul.f32 %v1339_v3, %v465_v7  ;;  %v596_v10 = vmul.f32 %v1338_v4, %v460_v8  ;;  %1438 = vmatmul.mubr.msk.bf16.vlgmr.msra.gmra.mxu1 %vm671_vm2, %v663_v6  ;;  %v1355_v3 = vunpack.c.h.bf16 %v1393_v61  ;;  %v1354_v4 = vunpack.c.l.bf16 %v1393_v61  ;;  %v630_v61 = vld [vmem:[#allocation2 + $0x38] sm:$0xff] }
  0xb3   : > { %v656_v14 = vpack.c.bf16 %v597_v9, %v596_v10 }
  0xb4   : > { %v545_v15 = vpop.permute.xlu1 %544  ;;  %v540_v16 = vpop.permute.xlu0 %539 }
  0xb5   : > { %v613_v17 = vmul.f32 %v1371_v11, %v545_v15  ;;  %v612_v18 = vmul.f32 %v1370_v12, %v540_v16  ;;  %1425 = vmatprep.mubr.msk.bf16.mxu0 %vm671_vm2, %v656_v14  ;;  %v1387_v11 = vunpack.c.h.bf16 %v1401_v5  ;;  %v1386_v12 = vunpack.c.l.bf16 %v1401_v5 }
  0xb7   : > { %v664_v22 = vpack.c.bf16 %v613_v17, %v612_v18 }
  0xb8   : > { %v475_v23 = vpop.permute.xlu1 %474  ;;  %v470_v24 = vpop.permute.xlu0 %469 }
  0xb9   : > { %v599_v25 = vmul.f32 %v1343_v19, %v475_v23  ;;  %v598_v26 = vmul.f32 %v1342_v20, %v470_v24  ;;  %1441 = vmatprep.mubr.msk.bf16.mxu1 %vm671_vm2, %v664_v22  ;;  %v1359_v19 = vunpack.c.h.bf16 %v1394_v13  ;;  %v1358_v20 = vunpack.c.l.bf16 %v1394_v13 }
  0xbb   : > { %v657_v30 = vpack.c.bf16 %v599_v25, %v598_v26 }
  0xbc   : > { %v555_v31 = vpop.permute.xlu1 %554  ;;  %v550_v32 = vpop.permute.xlu0 %549 }
  0xbd   : > { %v615_v33 = vmul.f32 %v1375_v27, %v555_v31  ;;  %v614_v34 = vmul.f32 %v1374_v28, %v550_v32  ;;  %1426 = vmatmul.mubr.msk.bf16.gmra.mxu0 %vm671_vm2, %v657_v30  ;;  %v405_v27 = vunpack.c.l.bf16 %v374_v21  ;;  %v625_v32 = vld [vmem:[#allocation2 + $0x10] sm:$0xff]  ;;  %v634_v21 = vld [vmem:[#allocation2 + $0x58] sm:$0xff] }
  0xbf   : > { %v665_v38 = vpack.c.bf16 %v615_v33, %v614_v34  ;;  %v623_v34 = vld [vmem:[#allocation2] sm:$0xff] }
  0xc0   : > { %v485_v39 = vpop.permute.xlu1 %484  ;;  %v480_v40 = vpop.permute.xlu0 %479 }
  0xc1   : > { %v601_v41 = vmul.f32 %v1347_v35, %v485_v39  ;;  %v600_v42 = vmul.f32 %v1346_v36, %v480_v40  ;;  %1442 = vmatmul.mubr.msk.bf16.gmra.mxu1 %vm671_vm2, %v665_v38  ;;  %v641_v38 = vld [vmem:[#allocation2 + $0x90] sm:$0xff] }
  0xc3   : > { %v658_v46 = vpack.c.bf16 %v601_v41, %v600_v42  ;;  %v624_v42 = vld [vmem:[#allocation2 + $0x8] sm:$0xff] }
  0xc4   : > { %v565_v47 = vpop.permute.xlu1 %564  ;;  %v560_v48 = vpop.permute.xlu0 %559 }
  0xc5   : > { %v617_v49 = vmul.f32 %v1379_v43, %v565_v47  ;;  %v616_v50 = vmul.f32 %v1378_v44, %v560_v48  ;;  %1429 = vmatprep.mubr.msk.bf16.mxu0 %vm671_vm2, %v658_v46  ;;  %v639_v43 = vld [vmem:[#allocation2 + $0x80] sm:$0xff]  ;;  %v642_v48 = vld [vmem:[#allocation2 + $0x98] sm:$0xff] }
  0xc7   : > { %v666_v54 = vpack.c.bf16 %v617_v49, %v616_v50 }
  0xc8   : > { %v495_v55 = vpop.permute.xlu1 %494  ;;  %v490_v56 = vpop.permute.xlu0 %489 }
  0xc9   : > { %v603_v57 = vmul.f32 %v1351_v51, %v495_v55  ;;  %v602_v58 = vmul.f32 %v1350_v52, %v490_v56  ;;  %1445 = vmatprep.mubr.msk.bf16.mxu1 %vm671_vm2, %v666_v54  ;;  %v640_v52 = vld [vmem:[#allocation2 + $0x88] sm:$0xff]  ;;  %v629_v56 = vld [vmem:[#allocation2 + $0x30] sm:$0xff] }
  0xcb   : > { %v659_v62 = vpack.c.bf16 %v603_v57, %v602_v58  ;;  %v627_v58 = vld [vmem:[#allocation2 + $0x20] sm:$0xff] }
  0xcc   : > { %v575_v63 = vpop.permute.xlu1 %574  ;;  %v570_v0 = vpop.permute.xlu0 %569 }
  0xcd   : > { %v619_v1 = vmul.f32 %v1383_v59, %v575_v63  ;;  %v618_v2 = vmul.f32 %v1382_v60, %v570_v0  ;;  %1430 = vmatmul.mubr.msk.bf16.gmra.mxu0 %vm671_vm2, %v659_v62  ;;  %v645_v62 = vld [vmem:[#allocation2 + $0xb0] sm:$0xff] }
  0xcf   : > { %v667_v6 = vpack.c.bf16 %v619_v1, %v618_v2  ;;  %v628_v2 = vld [vmem:[#allocation2 + $0x28] sm:$0xff] }
  0xd0   : > { %v505_v7 = vpop.permute.xlu1 %504  ;;  %v500_v8 = vpop.permute.xlu0 %499 }
  0xd1   : > { %v605_v9 = vmul.f32 %v1355_v3, %v505_v7  ;;  %v604_v10 = vmul.f32 %v1354_v4, %v500_v8  ;;  %1446 = vmatmul.mubr.msk.bf16.gmra.mxu1 %vm671_vm2, %v667_v6  ;;  %v643_v3 = vld [vmem:[#allocation2 + $0xa0] sm:$0xff]  ;;  %v646_v8 = vld [vmem:[#allocation2 + $0xb8] sm:$0xff] }
  0xd3   : > { %v660_v14 = vpack.c.bf16 %v605_v9, %v604_v10 }
  0xd4   : > { %v585_v15 = vpop.permute.xlu1 %584  ;;  %v580_v16 = vpop.permute.xlu0 %579 }
  0xd5   : > { %v621_v17 = vmul.f32 %v1387_v11, %v585_v15  ;;  %v620_v18 = vmul.f32 %v1386_v12, %v580_v16  ;;  %1433 = vmatprep.mubr.msk.bf16.mxu0 %vm671_vm2, %v660_v14  ;;  %v644_v12 = vld [vmem:[#allocation2 + $0xa8] sm:$0xff]  ;;  %v633_v16 = vld [vmem:[#allocation2 + $0x50] sm:$0xff] }
  0xd7   : > { %v668_v22 = vpack.c.bf16 %v621_v17, %v620_v18  ;;  %v631_v18 = vld [vmem:[#allocation2 + $0x40] sm:$0xff] }
  0xd8   : > { %v515_v23 = vpop.permute.xlu1 %514  ;;  %v510_v24 = vpop.permute.xlu0 %509 }
  0xd9   : > { %v607_v25 = vmul.f32 %v1359_v19, %v515_v23  ;;  %v606_v26 = vmul.f32 %v1358_v20, %v510_v24  ;;  %1449 = vmatprep.mubr.msk.bf16.mxu1 %vm671_vm2, %v668_v22  ;;  %v649_v22 = vld [vmem:[#allocation2 + $0xd0] sm:$0xff] }
  0xdb   : > { %v661_v28 = vpack.c.bf16 %v607_v25, %v606_v26  ;;  %v632_v26 = vld [vmem:[#allocation2 + $0x48] sm:$0xff] }
  0xdc   : > { %v590_v29 = vpop.permute.xlu0 %589 }
  0xdd   : > { %v622_v30 = vmul.f32 %v590_v29, %v405_v27  ;;  %1434 = vmatmul.mubr.msk.bf16.gmra.mxu0 %vm671_vm2, %v661_v28  ;;  %v647_v27 = vld [vmem:[#allocation2 + $0xc0] sm:$0xff] }
  0xdf   : > { %v669_v31 = vpack.c.bf16 %v622_v30, %v622_v30 }
  0xe1   : > { %1450 = vmatmul.mubr.msk.bf16.gmra.mxu1 %vm671_vm2, %v669_v31 }
 0x16d   : > { %v1423_v33 = vpop.f32.mrf.mxu0 }
 0x16e   : > { %v886_v35 = vadd.f32 %v1423_v33, %v625_v32  ;;  %v650_v32 = vld [vmem:[#allocation2 + $0xd8] sm:$0xff] }
 0x16f   : > { %v758_v36 = vpop.f32.mrf.mxu0 }
 0x170   : > { %918 = vst.msk [vmem:[#allocation2 + $0x10] sm:$0xff] %vm915_vm3, %v886_v35  ;;  %v884_v39 = vadd.f32 %v758_v36, %v623_v34  ;;  %v648_v36 = vld [vmem:[#allocation2 + $0xc8] sm:$0xff] }
 0x171   : > { %v1424_v40 = vpop.f32.mrf.mxu0  ;;  %v1439_v41 = vpop.f32.mrf.mxu1 }
 0x172   : > { %916 = vst.msk [vmem:[#allocation2] sm:$0xff] %vm915_vm3, %v884_v39  ;;  %v887_v44 = vadd.f32 %v1424_v40, %v626_v37  ;;  %v902_v45 = vadd.f32 %v1439_v41, %v641_v38  ;;  %v637_v40 = vld [vmem:[#allocation2 + $0x70] sm:$0xff] }
 0x173   : > { %v761_v46 = vpop.f32.mrf.mxu0  ;;  %v822_v47 = vpop.f32.mrf.mxu1 }
 0x174   : > { %919 = vst.msk [vmem:[#allocation2 + $0x18] sm:$0xff] %vm915_vm3, %v887_v44  ;;  %934 = vst.msk [vmem:[#allocation2 + $0x90] sm:$0xff] %vm915_vm3, %v902_v45  ;;  %v885_v49 = vadd.f32 %v761_v46, %v624_v42  ;;  %v900_v50 = vadd.f32 %v822_v47, %v639_v43  ;;  %v635_v42 = vld [vmem:[#allocation2 + $0x60] sm:$0xff]  ;;  %v638_v45 = vld [vmem:[#allocation2 + $0x78] sm:$0xff] }
 0x175   : > { %v1440_v51 = vpop.f32.mrf.mxu1  ;;  %v653_v46 = vld [vmem:[#allocation2 + $0xf0] sm:$0xff] }
 0x176   : > { %917 = vst.msk [vmem:[#allocation2 + $0x8] sm:$0xff] %vm915_vm3, %v885_v49  ;;  %932 = vst.msk [vmem:[#allocation2 + $0x80] sm:$0xff] %vm915_vm3, %v900_v50  ;;  %v903_v53 = vadd.f32 %v1440_v51, %v642_v48  ;;  %v636_v50 = vld [vmem:[#allocation2 + $0x68] sm:$0xff]  ;;  %v651_v51 = vld [vmem:[#allocation2 + $0xe0] sm:$0xff] }
 0x177   : > { %v825_v54 = vpop.f32.mrf.mxu1 }
 0x178   : > { %935 = vst.msk [vmem:[#allocation2 + $0x98] sm:$0xff] %vm915_vm3, %v903_v53  ;;  %v901_v55 = vadd.f32 %v825_v54, %v640_v52 }
 0x17a   : > { %933 = vst.msk [vmem:[#allocation2 + $0x88] sm:$0xff] %vm915_vm3, %v901_v55 }
 0x17d   : > { %v1427_v57 = vpop.f32.mrf.mxu0 }
 0x17e   : > { %v890_v59 = vadd.f32 %v1427_v57, %v629_v56 }
 0x17f   : > { %v774_v60 = vpop.f32.mrf.mxu0 }
 0x180   : > { %922 = vst.msk [vmem:[#allocation2 + $0x30] sm:$0xff] %vm915_vm3, %v890_v59  ;;  %v888_v63 = vadd.f32 %v774_v60, %v627_v58  ;;  %v652_v59 = vld [vmem:[#allocation2 + $0xe8] sm:$0xff] }
 0x181   : > { %v1428_v0 = vpop.f32.mrf.mxu0  ;;  %v1443_v1 = vpop.f32.mrf.mxu1 }
 0x182   : > { %920 = vst.msk [vmem:[#allocation2 + $0x20] sm:$0xff] %vm915_vm3, %v888_v63  ;;  %v891_v4 = vadd.f32 %v1428_v0, %v630_v61  ;;  %v906_v5 = vadd.f32 %v1443_v1, %v645_v62 }
 0x183   : > { %v777_v6 = vpop.f32.mrf.mxu0  ;;  %v838_v7 = vpop.f32.mrf.mxu1 }
 0x184   : > { %923 = vst.msk [vmem:[#allocation2 + $0x38] sm:$0xff] %vm915_vm3, %v891_v4  ;;  %938 = vst.msk [vmem:[#allocation2 + $0xb0] sm:$0xff] %vm915_vm3, %v906_v5  ;;  %v889_v9 = vadd.f32 %v777_v6, %v628_v2  ;;  %v904_v10 = vadd.f32 %v838_v7, %v643_v3 }
 0x185   : > { %v1444_v11 = vpop.f32.mrf.mxu1 }
 0x186   : > { %921 = vst.msk [vmem:[#allocation2 + $0x28] sm:$0xff] %vm915_vm3, %v889_v9  ;;  %936 = vst.msk [vmem:[#allocation2 + $0xa0] sm:$0xff] %vm915_vm3, %v904_v10  ;;  %v907_v13 = vadd.f32 %v1444_v11, %v646_v8 }
 0x187   : > { %v841_v14 = vpop.f32.mrf.mxu1 }
 0x188   : > { %939 = vst.msk [vmem:[#allocation2 + $0xb8] sm:$0xff] %vm915_vm3, %v907_v13  ;;  %v905_v15 = vadd.f32 %v841_v14, %v644_v12 }
 0x18a   : > { %937 = vst.msk [vmem:[#allocation2 + $0xa8] sm:$0xff] %vm915_vm3, %v905_v15 }
 0x18d   : > { %v1431_v17 = vpop.f32.mrf.mxu0 }
 0x18e   : > { %v894_v19 = vadd.f32 %v1431_v17, %v633_v16 }
 0x18f   : > { %v790_v20 = vpop.f32.mrf.mxu0 }
 0x190   : > { %926 = vst.msk [vmem:[#allocation2 + $0x50] sm:$0xff] %vm915_vm3, %v894_v19  ;;  %v892_v23 = vadd.f32 %v790_v20, %v631_v18 }
 0x191   : > { %v1432_v24 = vpop.f32.mrf.mxu0  ;;  %v1447_v25 = vpop.f32.mrf.mxu1 }
 0x192   : > { %924 = vst.msk [vmem:[#allocation2 + $0x40] sm:$0xff] %vm915_vm3, %v892_v23  ;;  %v895_v28 = vadd.f32 %v1432_v24, %v634_v21  ;;  %v910_v29 = vadd.f32 %v1447_v25, %v649_v22 }
 0x193   : > { %v793_v30 = vpop.f32.mrf.mxu0  ;;  %v854_v31 = vpop.f32.mrf.mxu1 }
 0x194   : > { %927 = vst.msk [vmem:[#allocation2 + $0x58] sm:$0xff] %vm915_vm3, %v895_v28  ;;  %942 = vst.msk [vmem:[#allocation2 + $0xd0] sm:$0xff] %vm915_vm3, %v910_v29  ;;  %v893_v33 = vadd.f32 %v793_v30, %v632_v26  ;;  %v908_v34 = vadd.f32 %v854_v31, %v647_v27 }
 0x195   : > { %v1448_v35 = vpop.f32.mrf.mxu1 }
 0x196   : > { %925 = vst.msk [vmem:[#allocation2 + $0x48] sm:$0xff] %vm915_vm3, %v893_v33  ;;  %940 = vst.msk [vmem:[#allocation2 + $0xc0] sm:$0xff] %vm915_vm3, %v908_v34  ;;  %v911_v37 = vadd.f32 %v1448_v35, %v650_v32 }
 0x197   : > { %v857_v38 = vpop.f32.mrf.mxu1 }
 0x198   : > { %943 = vst.msk [vmem:[#allocation2 + $0xd8] sm:$0xff] %vm915_vm3, %v911_v37  ;;  %v909_v39 = vadd.f32 %v857_v38, %v648_v36 }
 0x19a   : > { %941 = vst.msk [vmem:[#allocation2 + $0xc8] sm:$0xff] %vm915_vm3, %v909_v39 }
 0x19d   : > { %v1435_v41 = vpop.f32.mrf.mxu0 }
 0x19e   : > { %v898_v43 = vadd.f32 %v1435_v41, %v637_v40 }
 0x19f   : > { %v806_v44 = vpop.f32.mrf.mxu0 }
 0x1a0   : > { %930 = vst.msk [vmem:[#allocation2 + $0x70] sm:$0xff] %vm915_vm3, %v898_v43  ;;  %v896_v47 = vadd.f32 %v806_v44, %v635_v42 }
 0x1a1   : > { %v1436_v48 = vpop.f32.mrf.mxu0  ;;  %v1451_v49 = vpop.f32.mrf.mxu1 }
 0x1a2   : > { %928 = vst.msk [vmem:[#allocation2 + $0x60] sm:$0xff] %vm915_vm3, %v896_v47  ;;  %v899_v52 = vadd.f32 %v1436_v48, %v638_v45  ;;  %v914_v53 = vadd.f32 %v1451_v49, %v653_v46 }
 0x1a3   : > { %v809_v54 = vpop.f32.mrf.mxu0  ;;  %v870_v55 = vpop.f32.mrf.mxu1 }
 0x1a4   : > { %931 = vst.msk [vmem:[#allocation2 + $0x78] sm:$0xff] %vm915_vm3, %v899_v52  ;;  %946 = vst.msk [vmem:[#allocation2 + $0xf0] sm:$0xff] %vm915_vm3, %v914_v53  ;;  %v897_v56 = vadd.f32 %v809_v54, %v636_v50  ;;  %v912_v57 = vadd.f32 %v870_v55, %v651_v51 }
 0x1a5   : > { %v1452_v58 = vpop.f32.mrf.mxu1 }
 0x1a6   : > { %929 = vst.msk [vmem:[#allocation2 + $0x68] sm:$0xff] %vm915_vm3, %v897_v56  ;;  %944 = vst.msk [vmem:[#allocation2 + $0xe0] sm:$0xff] %vm915_vm3, %v912_v57  ;;  %950 = sbr.rel (%p1261_p6) target bundleno = 446 (0x1be), region = 48 }
 0x1a7   : > { %v873_v60 = vpop.f32.mrf.mxu1 }
 0x1a8   : > { %v913_v61 = vadd.f32 %v873_v60, %v652_v59 }
 0x1aa   : > { %945 = vst.msk [vmem:[#allocation2 + $0xe8] sm:$0xff] %vm915_vm3, %v913_v61 }
 0x1ab   : > { %v951_v62 = vld [vmem:[#allocation2] sm:$0xff]  ;;  %vm1107_vm4 = vcmask 60416   ;;  %v952_v63 = vld [vmem:[#allocation2 + $0x8] sm:$0xff]  ;;  %v953_v0 = vld [vmem:[#allocation2 + $0x10] sm:$0xff] }
 0x1ac   : > { %v1297_v1 = vpack.c.bf16 %v951_v62, %v951_v62  ;;  %v1298_v2 = vpack.c.bf16 %v952_v63, %v952_v63  ;;  %v1299_v3 = vpack.c.bf16 %v953_v0, %v953_v0  ;;  %v954_v4 = vld [vmem:[#allocation2 + $0x18] sm:$0xff]  ;;  %v955_v5 = vld [vmem:[#allocation2 + $0x20] sm:$0xff]  ;;  %v956_v6 = vld [vmem:[#allocation2 + $0x28] sm:$0xff] }
 0x1ad   : > { %v1300_v7 = vpack.c.bf16 %v954_v4, %v954_v4  ;;  %v1301_v8 = vpack.c.bf16 %v955_v5, %v955_v5  ;;  %v1302_v9 = vpack.c.bf16 %v956_v6, %v956_v6  ;;  %v957_v10 = vld [vmem:[#allocation2 + $0x30] sm:$0xff]  ;;  %v958_v11 = vld [vmem:[#allocation2 + $0x38] sm:$0xff]  ;;  %v959_v12 = vld [vmem:[#allocation2 + $0x40] sm:$0xff] }
 0x1ae   : > { %1108 = vst.msk [vmem:[%s1846_s5] sm:$0xf] %vm1107_vm4, %v1297_v1  ;;  %1109 = vst.msk [vmem:[%s1846_s5 + $0x4] sm:$0xf] %vm1107_vm4, %v1298_v2  ;;  %v1303_v13 = vpack.c.bf16 %v957_v10, %v957_v10  ;;  %v1304_v14 = vpack.c.bf16 %v958_v11, %v958_v11  ;;  %v1305_v15 = vpack.c.bf16 %v959_v12, %v959_v12  ;;  %v960_v16 = vld [vmem:[#allocation2 + $0x48] sm:$0xff]  ;;  %v961_v17 = vld [vmem:[#allocation2 + $0x50] sm:$0xff] }
 0x1af   : > { %1110 = vst.msk [vmem:[%s1846_s5 + $0x8] sm:$0xf] %vm1107_vm4, %v1299_v3  ;;  %v962_v18 = vld [vmem:[#allocation2 + $0x58] sm:$0xff]  ;;  %1111 = vst.msk [vmem:[%s1846_s5 + $0xc] sm:$0xf] %vm1107_vm4, %v1300_v7  ;;  %v1306_v19 = vpack.c.bf16 %v960_v16, %v960_v16  ;;  %v1307_v20 = vpack.c.bf16 %v961_v17, %v961_v17  ;;  %v963_v22 = vld [vmem:[#allocation2 + $0x60] sm:$0xff] }
 0x1b0   : > { %1112 = vst.msk [vmem:[%s1846_s5 + $0x10] sm:$0xf] %vm1107_vm4, %v1301_v8  ;;  %1113 = vst.msk [vmem:[%s1846_s5 + $0x14] sm:$0xf] %vm1107_vm4, %v1302_v9  ;;  %v1308_v21 = vpack.c.bf16 %v962_v18, %v962_v18  ;;  %v964_v23 = vld [vmem:[#allocation2 + $0x68] sm:$0xff]  ;;  %v965_v24 = vld [vmem:[#allocation2 + $0x70] sm:$0xff]  ;;  %v1309_v25 = vpack.c.bf16 %v963_v22, %v963_v22 }
 0x1b1   : > { %1114 = vst.msk [vmem:[%s1846_s5 + $0x18] sm:$0xf] %vm1107_vm4, %v1303_v13  ;;  %1115 = vst.msk [vmem:[%s1846_s5 + $0x1c] sm:$0xf] %vm1107_vm4, %v1304_v14  ;;  %v1310_v26 = vpack.c.bf16 %v964_v23, %v964_v23  ;;  %v1311_v27 = vpack.c.bf16 %v965_v24, %v965_v24  ;;  %v966_v28 = vld [vmem:[#allocation2 + $0x78] sm:$0xff]  ;;  %v967_v29 = vld [vmem:[#allocation2 + $0x80] sm:$0xff] }
 0x1b2   : > { %1116 = vst.msk [vmem:[%s1846_s5 + $0x20] sm:$0xf] %vm1107_vm4, %v1305_v15  ;;  %v968_v30 = vld [vmem:[#allocation2 + $0x88] sm:$0xff]  ;;  %1117 = vst.msk [vmem:[%s1846_s5 + $0x24] sm:$0xf] %vm1107_vm4, %v1306_v19  ;;  %v1312_v31 = vpack.c.bf16 %v966_v28, %v966_v28  ;;  %v1313_v32 = vpack.c.bf16 %v967_v29, %v967_v29  ;;  %v969_v34 = vld [vmem:[#allocation2 + $0x90] sm:$0xff] }
 0x1b3   : > { %1118 = vst.msk [vmem:[%s1846_s5 + $0x28] sm:$0xf] %vm1107_vm4, %v1307_v20  ;;  %1119 = vst.msk [vmem:[%s1846_s5 + $0x2c] sm:$0xf] %vm1107_vm4, %v1308_v21  ;;  %v1314_v33 = vpack.c.bf16 %v968_v30, %v968_v30  ;;  %v970_v35 = vld [vmem:[#allocation2 + $0x98] sm:$0xff]  ;;  %v971_v36 = vld [vmem:[#allocation2 + $0xa0] sm:$0xff]  ;;  %v1315_v37 = vpack.c.bf16 %v969_v34, %v969_v34 }
 0x1b4   : > { %1120 = vst.msk [vmem:[%s1846_s5 + $0x30] sm:$0xf] %vm1107_vm4, %v1309_v25  ;;  %1121 = vst.msk [vmem:[%s1846_s5 + $0x34] sm:$0xf] %vm1107_vm4, %v1310_v26  ;;  %v1316_v38 = vpack.c.bf16 %v970_v35, %v970_v35  ;;  %v1317_v39 = vpack.c.bf16 %v971_v36, %v971_v36  ;;  %v972_v40 = vld [vmem:[#allocation2 + $0xa8] sm:$0xff]  ;;  %v973_v41 = vld [vmem:[#allocation2 + $0xb0] sm:$0xff] }
 0x1b5   : > { %1122 = vst.msk [vmem:[%s1846_s5 + $0x38] sm:$0xf] %vm1107_vm4, %v1311_v27  ;;  %v974_v42 = vld [vmem:[#allocation2 + $0xb8] sm:$0xff]  ;;  %1123 = vst.msk [vmem:[%s1846_s5 + $0x3c] sm:$0xf] %vm1107_vm4, %v1312_v31  ;;  %v1318_v43 = vpack.c.bf16 %v972_v40, %v972_v40  ;;  %v1319_v44 = vpack.c.bf16 %v973_v41, %v973_v41  ;;  %v975_v46 = vld [vmem:[#allocation2 + $0xc0] sm:$0xff] }
 0x1b6   : > { %1124 = vst.msk [vmem:[%s1846_s5 + $0x40] sm:$0xf] %vm1107_vm4, %v1313_v32  ;;  %1125 = vst.msk [vmem:[%s1846_s5 + $0x44] sm:$0xf] %vm1107_vm4, %v1314_v33  ;;  %v1320_v45 = vpack.c.bf16 %v974_v42, %v974_v42  ;;  %v976_v47 = vld [vmem:[#allocation2 + $0xc8] sm:$0xff]  ;;  %v977_v48 = vld [vmem:[#allocation2 + $0xd0] sm:$0xff]  ;;  %v1321_v49 = vpack.c.bf16 %v975_v46, %v975_v46 }
 0x1b7   : > { %1126 = vst.msk [vmem:[%s1846_s5 + $0x48] sm:$0xf] %vm1107_vm4, %v1315_v37  ;;  %1127 = vst.msk [vmem:[%s1846_s5 + $0x4c] sm:$0xf] %vm1107_vm4, %v1316_v38  ;;  %v1322_v50 = vpack.c.bf16 %v976_v47, %v976_v47  ;;  %v1323_v51 = vpack.c.bf16 %v977_v48, %v977_v48  ;;  %v978_v52 = vld [vmem:[#allocation2 + $0xd8] sm:$0xff]  ;;  %v979_v53 = vld [vmem:[#allocation2 + $0xe0] sm:$0xff] }
 0x1b8   : > { %1128 = vst.msk [vmem:[%s1846_s5 + $0x50] sm:$0xf] %vm1107_vm4, %v1317_v39  ;;  %v980_v54 = vld [vmem:[#allocation2 + $0xe8] sm:$0xff]  ;;  %1129 = vst.msk [vmem:[%s1846_s5 + $0x54] sm:$0xf] %vm1107_vm4, %v1318_v43  ;;  %v1324_v55 = vpack.c.bf16 %v978_v52, %v978_v52  ;;  %v1325_v56 = vpack.c.bf16 %v979_v53, %v979_v53  ;;  %v981_v58 = vld [vmem:[#allocation2 + $0xf0] sm:$0xff] }
 0x1b9   : > { %1130 = vst.msk [vmem:[%s1846_s5 + $0x58] sm:$0xf] %vm1107_vm4, %v1319_v44  ;;  %1131 = vst.msk [vmem:[%s1846_s5 + $0x5c] sm:$0xf] %vm1107_vm4, %v1320_v45  ;;  %v1326_v57 = vpack.c.bf16 %v980_v54, %v980_v54  ;;  %v1327_v59 = vpack.c.bf16 %v981_v58, %v981_v58 }
 0x1ba   : > { %1132 = vst.msk [vmem:[%s1846_s5 + $0x60] sm:$0xf] %vm1107_vm4, %v1321_v49  ;;  %1133 = vst.msk [vmem:[%s1846_s5 + $0x64] sm:$0xf] %vm1107_vm4, %v1322_v50 }
 0x1bb   : > { %1134 = vst.msk [vmem:[%s1846_s5 + $0x68] sm:$0xf] %vm1107_vm4, %v1323_v51  ;;  %1135 = vst.msk [vmem:[%s1846_s5 + $0x6c] sm:$0xf] %vm1107_vm4, %v1324_v55 }
 0x1bc   : > { %1136 = vst.msk [vmem:[%s1846_s5 + $0x70] sm:$0xf] %vm1107_vm4, %v1325_v56  ;;  %1137 = vst.msk [vmem:[%s1846_s5 + $0x74] sm:$0xf] %vm1107_vm4, %v1326_v57 }
 0x1bd   : > { %1138 = vst.msk [vmem:[%s1846_s5 + $0x78] sm:$0xf] %vm1107_vm4, %v1327_v59 }
 0x1be PF: > { %s15_s20 = sadd.s32 1, %s1509_s20   ;;  %s1847_s18 = smov %s1505_s19 }
 0x1bf   : > { %p12_p7 = scmp.ge.s32.totalorder %s15_s20, 29   ;;  %s1848_s19 = smov %s1850_s3 }
 0x1c1   :  { %14 = sbr.rel (!%p12_p7) target bundleno = 2 (0x2), region = 84 }

</bundles_post_ra>
